<compile_context>
chip_gen: v7x
topology: tpu7x:2x2x1
jax: 0.10.0
libtpu: 0.0.40
codegen_flags: <defaults>
</compile_context>

<pallas_src>
import jax
import jax.numpy as jnp
from jax.experimental import pallas as pl
from jax.experimental.pallas import tpu as pltpu

HIDDEN1 = 800
HIDDEN2 = 128


def _round_up(n, m):
    return (n + m - 1) // m * m


def _choose_batch_tile(batch):
    """Batch tile: multiple of 8, capped at 512, and guaranteeing >=2 grid steps
    whenever the (padded) batch allows it so the 'parallel' axis can split across
    v7x's two TensorCores."""
    b_pad = _round_up(batch, 8)
    if b_pad < 16:
        return b_pad                      # single tiny tile; grid=(1,)
    half_dn = max(8, (b_pad // 2) // 8 * 8)
    return min(512, half_dn)


def _actor_kernel(x_ref, w1_ref, b1_ref, w2_ref, b2_ref, w3_ref, b3_ref, out_ref):
    # x arrives already bf16 (cast in the wrapper); bf16 operands feed the MXU fast
    # path on v5e/v6e/v7x, accumulation stays f32 via preferred_element_type.
    x = x_ref[...]

    h1 = jnp.dot(x, w1_ref[...], preferred_element_type=jnp.float32) + b1_ref[...]
    h1 = jnp.maximum(h1, 0.0).astype(jnp.bfloat16)

    h2 = jnp.dot(h1, w2_ref[...], preferred_element_type=jnp.float32) + b2_ref[...]
    h2 = jnp.maximum(h2, 0.0).astype(jnp.bfloat16)

    # Emit raw logits (lane-dense: minor dim = round_up(action_dim*atoms, 128)).
    # The per-group softmax is done in the wrapper on the unpadded slice.
    logits = jnp.dot(h2, w3_ref[...], preferred_element_type=jnp.float32) + b3_ref[...]
    out_ref[...] = logits.astype(out_ref.dtype)


def prepare_params(params, *, action_dim, atoms, compute_dtype=jnp.bfloat16):
    """Pad + cast torch-layout params (w: (in,out), b: (1,out)) for the kernel.

    Only the TOTAL head width is padded to a multiple of 128 lanes (zero columns /
    zero bias); the padded logit columns are sliced off before the wrapper softmax,
    so their value never matters.
    """
    h1_pad = _round_up(HIDDEN1, 128)                    # 896
    head = action_dim * atoms
    head_pad = _round_up(head, 128)

    state_dim = params["w1"].shape[0]

    w1 = jnp.zeros((state_dim, h1_pad), jnp.float32).at[:, :HIDDEN1].set(params["w1"])
    b1 = jnp.zeros((1, h1_pad), jnp.float32).at[:, :HIDDEN1].set(params["b1"])
    w2 = jnp.zeros((h1_pad, HIDDEN2), jnp.float32).at[:HIDDEN1, :].set(params["w2"])
    b2 = params["b2"].astype(jnp.float32)
    w3 = jnp.zeros((HIDDEN2, head_pad), jnp.float32).at[:, :head].set(params["w3"])
    b3 = jnp.zeros((1, head_pad), jnp.float32).at[:, :head].set(params["b3"])

    return {
        "w1": w1.astype(compute_dtype), "b1": b1,
        "w2": w2.astype(compute_dtype), "b2": b2,
        "w3": w3.astype(compute_dtype), "b3": b3,
    }


def categorical_net_forward(x, prepared, *, action_dim, atoms):
    """Pallas forward of CagetorialNet (vector obs branch).

    x: [B, state_dim] float32; prepared: output of prepare_params.
    returns: [B, action_dim, atoms] float32 (per-atom categorical distributions)
    """
    B, state_dim = x.shape
    h1_pad = prepared["w1"].shape[1]
    head_pad = prepared["w3"].shape[1]
    head = action_dim * atoms

    tb = _choose_batch_tile(B)
    b_pad = _round_up(B, tb)

    xb = x.astype(jnp.bfloat16)            # half the x DMA bytes; bf16 MXU operand
    if b_pad != B:
        xb = jnp.pad(xb, ((0, b_pad - B), (0, 0)))
    grid = (b_pad // tb,)

    # Weights/biases have constant index maps -> VMEM-resident across the batch grid;
    # only the x / logits blocks are streamed and double-buffered.
    in_specs = [
        pl.BlockSpec((tb, state_dim), lambda i: (i, 0)),
        pl.BlockSpec((state_dim, h1_pad), lambda i: (0, 0)),
        pl.BlockSpec((1, h1_pad), lambda i: (0, 0)),
        pl.BlockSpec((h1_pad, HIDDEN2), lambda i: (0, 0)),
        pl.BlockSpec((1, HIDDEN2), lambda i: (0, 0)),
        pl.BlockSpec((HIDDEN2, head_pad), lambda i: (0, 0)),
        pl.BlockSpec((1, head_pad), lambda i: (0, 0)),
    ]
    out_spec = pl.BlockSpec((tb, head_pad), lambda i: (i, 0))

    flops = 2 * b_pad * (state_dim * h1_pad + h1_pad * HIDDEN2 + HIDDEN2 * head_pad)
    bytes_accessed = int(
        xb.size * xb.dtype.itemsize
        + sum(prepared[k].size * prepared[k].dtype.itemsize
              for k in ("w1", "b1", "w2", "b2", "w3", "b3"))
        + b_pad * head_pad * 4)
    cost = pl.CostEstimate(flops=flops, transcendentals=0,
                           bytes_accessed=bytes_accessed)

    logits = pl.pallas_call(
        _actor_kernel,
        out_shape=jax.ShapeDtypeStruct((b_pad, head_pad), jnp.float32),
        grid=grid,
        in_specs=in_specs,
        out_specs=out_spec,
        compiler_params=pltpu.CompilerParams(
            dimension_semantics=("parallel",),      # batch axis across TCs on v7x
            vmem_limit_bytes=32 * 1024 * 1024),
        cost_estimate=cost,
    )(xb, prepared["w1"], prepared["b1"], prepared["w2"], prepared["b2"],
      prepared["w3"], prepared["b3"])

    # Wrapper-side layout plumbing + tiny group softmax (XLA fuses it); matches
    # F.softmax(x.view(-1, atoms), -1).view(-1, action_dim, atoms).
    logits = logits[:B, :head]
    probs = jax.nn.softmax(logits.reshape(B * action_dim, atoms), axis=-1)
    return probs.reshape(B, action_dim, atoms)


def init_params(key, state_dim, action_dim, atoms):
    """Deterministic init mimicking torch.nn.Linear default (U[-1/sqrt(fan_in), +])."""
    def linear(key, fan_in, fan_out):
        kw, kb = jax.random.split(key)
        bound = 1.0 / jnp.sqrt(jnp.float32(fan_in))
        w = jax.random.uniform(kw, (fan_in, fan_out), jnp.float32, -bound, bound)
        b = jax.random.uniform(kb, (1, fan_out), jnp.float32, -bound, bound)
        return w, b

    k1, k2, k3 = jax.random.split(key, 3)
    w1, b1 = linear(k1, state_dim, HIDDEN1)
    w2, b2 = linear(k2, HIDDEN1, HIDDEN2)
    w3, b3 = linear(k3, HIDDEN2, action_dim * atoms)
    return {"w1": w1, "b1": b1, "w2": w2, "b2": b2, "w3": w3, "b3": b3}


def reference_forward(x, params, *, action_dim, atoms):
    h1 = jax.nn.relu(x @ params["w1"] + params["b1"])
    h2 = jax.nn.relu(h1 @ params["w2"] + params["b2"])
    logits = h2 @ params["w3"] + params["b3"]
    probs = jax.nn.softmax(logits.reshape(-1, atoms), axis=-1)
    return probs.reshape(-1, action_dim, atoms)


if __name__ == "__main__":
    # TODO(synk): Actor_img / modules.cnn.Net branch is not defined in the spec; only
    # the vector-observation Actor branch of CagetorialNet is implemented here.
    key = jax.random.PRNGKey(0)
    kx, kp = jax.random.split(key)

    # Small shapes consistent with the module: vector obs, C51-style categorical head.
    B, STATE_DIM, ACTION_DIM, ATOMS = 2, 16, 4, 8

    x = jax.random.normal(kx, (B, STATE_DIM), jnp.float32)
    params = init_params(kp, STATE_DIM, ACTION_DIM, ATOMS)
    prepared = prepare_params(params, action_dim=ACTION_DIM, atoms=ATOMS)

    out = categorical_net_forward(x, prepared, action_dim=ACTION_DIM, atoms=ATOMS)
    out = jax.block_until_ready(out)

    ref = reference_forward(x, params, action_dim=ACTION_DIM, atoms=ATOMS)
    assert out.shape == (B, ACTION_DIM, ATOMS)
    # bf16 weights/activations (f32 accumulation) vs f32 reference -> loosened tolerance.
    assert jnp.max(jnp.abs(out - ref)) < 2e-2
    # Rows of the categorical distribution must sum to 1.
    assert jnp.allclose(jnp.sum(out, axis=-1), 1.0, atol=1e-3)

    print("KERNEL_OK")
</pallas_src>

<mosaic_0001>
module attributes {stable_mosaic.version = 11 : i64} {
  func.func @_actor_kernel(%arg0: i32, %arg1: memref<8x16xbf16, #tpu.memory_space<vmem>>, %arg2: memref<16x896xbf16, #tpu.memory_space<vmem>>, %arg3: memref<1x896xf32, #tpu.memory_space<vmem>>, %arg4: memref<896x128xbf16, #tpu.memory_space<vmem>>, %arg5: memref<1x128xf32, #tpu.memory_space<vmem>>, %arg6: memref<128x128xbf16, #tpu.memory_space<vmem>>, %arg7: memref<1x128xf32, #tpu.memory_space<vmem>>, %arg8: memref<8x128xf32, #tpu.memory_space<vmem>>) attributes {dimension_semantics = [#tpu.dimension_semantics<parallel>], iteration_bounds = array<i64: 1>, scalar_prefetch = 0 : i64, scratch_operands = 0 : i64, tpu.core_type = #tpu.core_type<tc>, window_params = [{transform_indices = @transform_0, window_bounds = array<i64: 8, 16>}, {pipeline_mode = #tpu.pipeline_mode<synchronous>, transform_indices = @transform_1, window_bounds = array<i64: 16, 896>}, {pipeline_mode = #tpu.pipeline_mode<synchronous>, transform_indices = @transform_2, window_bounds = array<i64: 1, 896>}, {pipeline_mode = #tpu.pipeline_mode<synchronous>, transform_indices = @transform_3, window_bounds = array<i64: 896, 128>}, {pipeline_mode = #tpu.pipeline_mode<synchronous>, transform_indices = @transform_4, window_bounds = array<i64: 1, 128>}, {pipeline_mode = #tpu.pipeline_mode<synchronous>, transform_indices = @transform_5, window_bounds = array<i64: 128, 128>}, {pipeline_mode = #tpu.pipeline_mode<synchronous>, transform_indices = @transform_6, window_bounds = array<i64: 1, 128>}, {transform_indices = @transform_7, window_bounds = array<i64: 8, 128>}]} {
    %c0 = arith.constant 0 : index
    %c0_0 = arith.constant 0 : index
    %0 = vector.load %arg1[%c0, %c0_0] : memref<8x16xbf16, #tpu.memory_space<vmem>>, vector<8x16xbf16>
    %c0_1 = arith.constant 0 : index
    %c0_2 = arith.constant 0 : index
    %1 = vector.load %arg2[%c0_1, %c0_2] : memref<16x896xbf16, #tpu.memory_space<vmem>>, vector<16x896xbf16>
    %cst = arith.constant dense<0.000000e+00> : vector<8x896xf32>
    %2 = tpu.matmul %0, %1, %cst {dimension_numbers = #tpu.dot_dimension_numbers<[1], [0], [0], [1], [0, 0, 1, 1], [], []>} : vector<8x16xbf16>, vector<16x896xbf16>, vector<8x896xf32> -> vector<8x896xf32>
    %c0_3 = arith.constant 0 : index
    %c0_4 = arith.constant 0 : index
    %3 = vector.load %arg3[%c0_3, %c0_4] : memref<1x896xf32, #tpu.memory_space<vmem>>, vector<1x896xf32>
    %4 = vector.broadcast %3 : vector<1x896xf32> to vector<8x896xf32>
    %5 = arith.addf %2, %4 : vector<8x896xf32>
    %cst_5 = arith.constant 0.000000e+00 : f32
    %6 = vector.broadcast %cst_5 : f32 to vector<8x896xf32>
    %7 = arith.maximumf %5, %6 : vector<8x896xf32>
    %8 = arith.truncf %7 : vector<8x896xf32> to vector<8x896xbf16>
    %c0_6 = arith.constant 0 : index
    %c0_7 = arith.constant 0 : index
    %9 = vector.load %arg4[%c0_6, %c0_7] : memref<896x128xbf16, #tpu.memory_space<vmem>>, vector<896x128xbf16>
    %cst_8 = arith.constant dense<0.000000e+00> : vector<8x128xf32>
    %10 = tpu.matmul %8, %9, %cst_8 {dimension_numbers = #tpu.dot_dimension_numbers<[1], [0], [0], [1], [0, 0, 1, 1], [], []>} : vector<8x896xbf16>, vector<896x128xbf16>, vector<8x128xf32> -> vector<8x128xf32>
    %c0_9 = arith.constant 0 : index
    %c0_10 = arith.constant 0 : index
    %11 = vector.load %arg5[%c0_9, %c0_10] : memref<1x128xf32, #tpu.memory_space<vmem>>, vector<1x128xf32>
    %12 = vector.broadcast %11 : vector<1x128xf32> to vector<8x128xf32>
    %13 = arith.addf %10, %12 : vector<8x128xf32>
    %cst_11 = arith.constant 0.000000e+00 : f32
    %14 = vector.broadcast %cst_11 : f32 to vector<8x128xf32>
    %15 = arith.maximumf %13, %14 : vector<8x128xf32>
    %16 = arith.truncf %15 : vector<8x128xf32> to vector<8x128xbf16>
    %c0_12 = arith.constant 0 : index
    %c0_13 = arith.constant 0 : index
    %17 = vector.load %arg6[%c0_12, %c0_13] : memref<128x128xbf16, #tpu.memory_space<vmem>>, vector<128x128xbf16>
    %cst_14 = arith.constant dense<0.000000e+00> : vector<8x128xf32>
    %18 = tpu.matmul %16, %17, %cst_14 {dimension_numbers = #tpu.dot_dimension_numbers<[1], [0], [0], [1], [0, 0, 1, 1], [], []>} : vector<8x128xbf16>, vector<128x128xbf16>, vector<8x128xf32> -> vector<8x128xf32>
    %c0_15 = arith.constant 0 : index
    %c0_16 = arith.constant 0 : index
    %19 = vector.load %arg7[%c0_15, %c0_16] : memref<1x128xf32, #tpu.memory_space<vmem>>, vector<1x128xf32>
    %20 = vector.broadcast %19 : vector<1x128xf32> to vector<8x128xf32>
    %21 = arith.addf %18, %20 : vector<8x128xf32>
    %c0_17 = arith.constant 0 : index
    %c0_18 = arith.constant 0 : index
    %22 = vector.load %arg8[%c0_17, %c0_18] : memref<8x128xf32, #tpu.memory_space<vmem>>, vector<8x128xf32>
    tpu.vector_store %arg8[%c0_17, %c0_18], %21 {strides = array<i32>} : memref<8x128xf32, #tpu.memory_space<vmem>>, vector<8x128xf32>,
    return
  }
  func.func @transform_0(%arg0: i32) -> (i32, i32) {
    %c0_i32 = arith.constant 0 : i32
    %c0_i32_0 = arith.constant 0 : i32
    return %arg0, %c0_i32 : i32, i32
  }
  func.func @transform_1(%arg0: i32) -> (i32, i32) {
    %c0_i32 = arith.constant 0 : i32
    %c0_i32_0 = arith.constant 0 : i32
    %c0_i32_1 = arith.constant 0 : i32
    return %c0_i32, %c0_i32_0 : i32, i32
  }
  func.func @transform_2(%arg0: i32) -> (i32, i32) {
    %c0_i32 = arith.constant 0 : i32
    %c0_i32_0 = arith.constant 0 : i32
    %c0_i32_1 = arith.constant 0 : i32
    return %c0_i32, %c0_i32_0 : i32, i32
  }
  func.func @transform_3(%arg0: i32) -> (i32, i32) {
    %c0_i32 = arith.constant 0 : i32
    %c0_i32_0 = arith.constant 0 : i32
    %c0_i32_1 = arith.constant 0 : i32
    return %c0_i32, %c0_i32_0 : i32, i32
  }
  func.func @transform_4(%arg0: i32) -> (i32, i32) {
    %c0_i32 = arith.constant 0 : i32
    %c0_i32_0 = arith.constant 0 : i32
    %c0_i32_1 = arith.constant 0 : i32
    return %c0_i32, %c0_i32_0 : i32, i32
  }
  func.func @transform_5(%arg0: i32) -> (i32, i32) {
    %c0_i32 = arith.constant 0 : i32
    %c0_i32_0 = arith.constant 0 : i32
    %c0_i32_1 = arith.constant 0 : i32
    return %c0_i32, %c0_i32_0 : i32, i32
  }
  func.func @transform_6(%arg0: i32) -> (i32, i32) {
    %c0_i32 = arith.constant 0 : i32
    %c0_i32_0 = arith.constant 0 : i32
    %c0_i32_1 = arith.constant 0 : i32
    return %c0_i32, %c0_i32_0 : i32, i32
  }
  func.func @transform_7(%arg0: i32) -> (i32, i32) {
    %c0_i32 = arith.constant 0 : i32
    %c0_i32_0 = arith.constant 0 : i32
    return %arg0, %c0_i32 : i32, i32
  }
}

</mosaic_0001>

<bundles_post_ra>
// kernel: tpu_custom_call.1
= control target key start
LH: loop header
LB: loop body
LE: loop exit
PB: predicated region body
PF: predicated region fallthrough
CT: control target
= control target key end

     0   :  { %12 = vsyncpa [#allocation3], 0  ;;  %s1669_s0 = inlined_call_operand.hbm [shape: bf16[8,16], index: 0, kind: input, shape index: {}]   ;;  %s1670_s1 = inlined_call_operand.hbm [shape: bf16[16,896], index: 1, kind: input, shape index: {}]   ;;  %s1671_s2 = inlined_call_operand.vmem [shape: f32[1,896], index: 2, kind: input, shape index: {}]   ;;  %s1672_s3 = inlined_call_operand.hbm [shape: bf16[896,128], index: 3, kind: input, shape index: {}]   ;;  %s1673_s4 = inlined_call_operand.vmem [shape: f32[1,128], index: 4, kind: input, shape index: {}]   ;;  %s1674_s5 = inlined_call_operand.hbm [shape: bf16[128,128], index: 5, kind: input, shape index: {}]   ;;  %s1675_s6 = inlined_call_operand.vmem [shape: f32[1,128], index: 6, kind: input, shape index: {}]   ;;  %s1676_s7 = inlined_call_operand.hbm [shape: f32[8,128], index: 7, kind: output, shape index: {}]  }
   0x1   :  { %13 = vsyncpa [#allocation6], 0 }
   0x2   :  { %14 = vsyncpa [#allocation9], 0 }
   0x3   :  { %15 = vsyncpa [#allocation4], 0  ;;  %s1503_s24 = smov [#allocation5]   ;;  %s1385_s28 = scalar_lea.hbm %s1670_s1, 896 }
   0x4   :  { %s31_s25 = sshll.u32 %s1503_s24, 4  ;;  %p1386_p0 = scmp.ne.s32.totalorder %s1670_s1, %s1385_s28  ;;  %s32_s25 = int_to_ptr.vmem [resolvable:$true] %s31_s25 }
   0x5   :  { %p1389_p1 = scmp.lt.u32.totalorder %s1385_s28, %s1670_s1 }
   0x7   :  { %p1391_p2 = pnand %p1389_p1, %p1386_p0 }
   0x9   :  { %1394 = shalt.err (!%p1391_p2)
}
   0xa   :  { %s1395_s10 = scalar_lea.vmem %s32_s25, 896  ;;  %p1400_p4 = scmp.lt.s32.totalorder %s32_s25, %s32_s25 }
   0xb   :  { %p1396_p3 = scmp.ne.s32.totalorder %s32_s25, %s1395_s10  ;;  %p1401_p5 = scmp.lt.s32.totalorder %s1395_s10, %s1395_s10 }
   0xd   :  { %p1402_p6 = por %p1401_p5, %p1400_p4 }
   0xf   :  { %p1403_p7 = pnand %p1402_p6, %p1396_p3 }
  0x11   :  { %1406 = shalt.err (!%p1403_p7)
}
  0x12   :  { %s1504_s11 = smov 448   ;;  %s1505_s12 = smov 28  }
  0x13   :  { %37 = dma.hbm_to_vmem [thread:$0]  %s1670_s1, 896, %s32_s25, [#allocation6], %s1504_s11, %s1504_s11, %s1505_s12  }
  0x14   :  { %s1506_s15 = smov [#allocation2]   ;;  %s1507_s17 = smov [#allocation7]  }
  0x15   :  { %s22_s16 = sshll.u32 %s1506_s15, 4  ;;  %s45_s18 = sshll.u32 %s1507_s17, 4  ;;  %s23_s16 = int_to_ptr.vmem [resolvable:$true] %s22_s16  ;;  %s46_s18 = int_to_ptr.vmem [resolvable:$true] %s45_s18 }
  0x16   :  { %s1407_s21 = scalar_lea.hbm %s1669_s0, 64 }
  0x17   :  { %p1408_p8 = scmp.ne.s32.totalorder %s1669_s0, %s1407_s21  ;;  %p1411_p9 = scmp.lt.u32.totalorder %s1407_s21, %s1669_s0 }
  0x19   :  { %p1413_p10 = pnand %p1411_p9, %p1408_p8 }
  0x1b   :  { %1416 = shalt.err (!%p1413_p10)
}
  0x1c   :  { %s1417_s1 = scalar_lea.vmem %s23_s16, 64  ;;  %p1422_p12 = scmp.lt.s32.totalorder %s23_s16, %s23_s16 }
  0x1d   :  { %p1418_p11 = scmp.ne.s32.totalorder %s23_s16, %s1417_s1  ;;  %p1423_p13 = scmp.lt.s32.totalorder %s1417_s1, %s1417_s1 }
  0x1f   :  { %p1424_p0 = por %p1423_p13, %p1422_p12 }
  0x21   :  { %p1425_p1 = pnand %p1424_p0, %p1418_p11 }
  0x23   :  { %1428 = shalt.err (!%p1425_p1)
}
  0x24   :  { %25 = dma.hbm_to_vmem [thread:$0]  %s1669_s0, 64, %s23_s16, [#allocation3]  }
  0x25   :  { %s1429_s30 = scalar_lea.hbm %s1672_s3, 7168 }
  0x26   :  { %p1430_p2 = scmp.ne.s32.totalorder %s1672_s3, %s1429_s30  ;;  %p1433_p3 = scmp.lt.u32.totalorder %s1429_s30, %s1672_s3 }
  0x28   :  { %p1435_p4 = pnand %p1433_p3, %p1430_p2 }
  0x2a   :  { %1438 = shalt.err (!%p1435_p4)
}
  0x2b   :  { %s1439_s12 = scalar_lea.vmem %s46_s18, 7168  ;;  %p1444_p6 = scmp.lt.s32.totalorder %s46_s18, %s46_s18 }
  0x2c   :  { %p1440_p5 = scmp.ne.s32.totalorder %s46_s18, %s1439_s12  ;;  %p1445_p7 = scmp.lt.s32.totalorder %s1439_s12, %s1439_s12 }
  0x2e   :  { %p1446_p8 = por %p1445_p7, %p1444_p6 }
  0x30   :  { %p1447_p9 = pnand %p1446_p8, %p1440_p5 }
  0x32   :  { %1450 = shalt.err (!%p1447_p9)
}
  0x33   :  { %s1508_s0 = smov 64   ;;  %s1509_s13 = smov 4  }
  0x34   :  { %51 = dma.hbm_to_vmem [thread:$0]  %s1672_s3, 7168, %s46_s18, [#allocation6], %s1508_s0, %s1508_s0, %s1509_s13  }
  0x35   :  { %s1510_s16 = smov [#allocation8]   ;;  %s1451_s21 = scalar_lea.hbm %s1674_s5, 1024 }
  0x36   :  { %s59_s17 = sshll.u32 %s1510_s16, 4  ;;  %p1452_p10 = scmp.ne.s32.totalorder %s1674_s5, %s1451_s21  ;;  %s60_s17 = int_to_ptr.vmem [resolvable:$true] %s59_s17 }
  0x37   :  { %p1455_p11 = scmp.lt.u32.totalorder %s1451_s21, %s1674_s5 }
  0x39   :  { %p1457_p12 = pnand %p1455_p11, %p1452_p10 }
  0x3b   :  { %1460 = shalt.err (!%p1457_p12)
}
  0x3c   :  { %s1461_s1 = scalar_lea.vmem %s60_s17, 1024  ;;  %p1466_p0 = scmp.lt.s32.totalorder %s60_s17, %s60_s17 }
  0x3d   :  { %p1462_p13 = scmp.ne.s32.totalorder %s60_s17, %s1461_s1  ;;  %p1467_p1 = scmp.lt.s32.totalorder %s1461_s1, %s1461_s1 }
  0x3f   :  { %p1468_p2 = por %p1467_p1, %p1466_p0 }
  0x41   :  { %p1469_p3 = pnand %p1468_p2, %p1462_p13 }
  0x43   :  { %1472 = shalt.err (!%p1469_p3)
}
  0x44   :  { %65 = dma.hbm_to_vmem [thread:$0]  %s1674_s5, 1024, %s60_s17, [#allocation9], %s1508_s0, %s1508_s0, %s1509_s13  }
  0x45   :  { %1495 = dma.done.wait [#allocation3], 64  }
  0x46   :  { %1496 = vsyncadd [#allocation3], 4294967232 }
  0x47   :  { %1497 = dma.done.wait [#allocation6], 8064  }
  0x48   :  { %1498 = vsyncadd [#allocation6], 4294959232 }
  0x49   :  { %1499 = dma.done.wait [#allocation9], 1024  }
  0x4a   :  { %1500 = vsyncadd [#allocation9], 4294966272  ;;  %v1511_v0 = vmov 0   ;;  %v1311_v1 = vld [vmem:[#allocation5 + $0x4] ss:$28 sps:$4 sm:$0xff]   ;;  %vm163_vm0 = vcmask 130048   ;;  %v92_v43 = vlaneseq }
  0x4b   :  { %199 = vmatprep.mubr.bf16.mxu1 %v1511_v0  ;;  %v1313_v2 = vld [vmem:[#allocation5] ss:$28 sps:$4 sm:$0xff]   ;;  %167 = vmatprep.subr.bf16.mxu1 %v1311_v1  ;;  %v1316_v4 = vld [vmem:[#allocation5 + $0xc] ss:$28 sps:$4 sm:$0xff]   ;;  %v1319_v6 = vld [vmem:[#allocation5 + $0x14] ss:$28 sps:$4 sm:$0xff]  }
  0x4c   :  { %v81_v3 = vld [vmem:[#allocation2] sm:$0xf]  ;;  %168 = vmatpush1.bf16.msra.mxu1 %v1313_v2  ;;  %v1314_v5 = vld [vmem:[#allocation5 + $0x8] ss:$28 sps:$4 sm:$0xff]   ;;  %v1317_v12 = vld [vmem:[#allocation5 + $0x10] ss:$28 sps:$4 sm:$0xff]  }
  0x4d   :  { %208 = vmatprep.subr.bf16.mxu1 %v1316_v4  ;;  %v1321_v7 = vld [vmem:[#allocation7 + $0x40] sm:$0xff]   ;;  %v1323_v9 = vld [vmem:[#allocation7 + $0x48] sm:$0xff]   ;;  %v1325_v11 = vld [vmem:[#allocation7 + $0x50] sm:$0xff]   ;;  %v1512_v15 = vmov 0.0   ;;  %vm1513_vm1 = vmmov 0   ;;  %v1611_v44 = vshrl.u32 %v92_v43, 7 }
  0x4e   :  { %v1322_v8 = vld [vmem:[#allocation7] sm:$0xff]   ;;  %1169 = vmatprep.subr.bf16.mxu0 %v1321_v7  ;;  %v1324_v10 = vld [vmem:[#allocation7 + $0x8] sm:$0xff]   ;;  %v1327_v13 = vld [vmem:[#allocation7 + $0x10] sm:$0xff]   ;;  %s1514_s29 = smov [#allocation10]  }
  0x4f   :  { %1097 = vmatmul.mubr.msk.bf16.vlgmr.msra.gmra.mrb[0].mxu1 %vm163_vm0, %v81_v3  ;;  %1170 = vmatpush3.bf16.msra.mxu0 %v1322_v8  ;;  %v1329_v14 = vld [vmem:[#allocation7 + $0x58] sm:$0xff]   ;;  %v1333_v17 = vld [vmem:[#allocation7 + $0x60] sm:$0xff]   ;;  %v1337_v21 = vld [vmem:[#allocation7 + $0x68] sm:$0xff]   ;;  %v94_v45 = vsub.s32 0, %v1611_v44  ;;  %v98_v47 = vsub.s32 1, %v1611_v44  ;;  %v102_v53 = vsub.s32 2, %v1611_v44 }
  0x50   :  { %209 = vmatpush1.bf16.msra.mxu1 %v1314_v5  ;;  %240 = vmatprep.mubr.bf16.mxu1 %v1511_v0  ;;  %v1331_v16 = vld [vmem:[#allocation7 + $0x18] sm:$0xff]   ;;  %v1326_v19 = vld [vmem:[#allocation7 + $0xc0] sm:$0xff]   ;;  %v1339_v23 = vld [vmem:[#allocation7 + $0x28] sm:$0xff]   ;;  %v106_v56 = vsub.s32 3, %v1611_v44  ;;  %v114_v8 = vsub.s32 5, %v1611_v44  ;;  %v118_v43 = vsub.s32 6, %v1611_v44 }
  0x51   :  { %249 = vmatprep.subr.bf16.mxu1 %v1319_v6  ;;  %1171 = vmatprep.subr.bf16.mxu0 %v1323_v9  ;;  %v1320_v18 = vld [vmem:[#allocation5 + $0x18] ss:$28 sps:$4 sm:$0xff]   ;;  %v1330_v24 = vld [vmem:[#allocation7 + $0xc8] sm:$0xff]   ;;  %v1334_v26 = vld [vmem:[#allocation7 + $0xd0] sm:$0xff]   ;;  %s1079_s30 = sshll.u32 %s1514_s29, 4  ;;  %s1080_s30 = int_to_ptr.vmem [resolvable:$true] %s1079_s30 }
  0x52   :  { %v1335_v20 = vld [vmem:[#allocation7 + $0x20] sm:$0xff]   ;;  %v1332_v25 = vld [vmem:[#allocation7 + $0x88] sm:$0xff]   ;;  %v1336_v27 = vld [vmem:[#allocation7 + $0x90] sm:$0xff]   ;;  %s1473_s8 = scalar_lea.vmem %s1080_s30, 128  ;;  %p1478_p5 = scmp.lt.s32.totalorder %s1080_s30, %s1080_s30 }
  0x53   :  { %1172 = vmatpush3.bf16.msra.mxu0 %v1324_v10  ;;  %v1328_v22 = vld [vmem:[#allocation7 + $0x80] sm:$0xff]   ;;  %v1338_v28 = vld [vmem:[#allocation7 + $0xd8] sm:$0xff]   ;;  %v1341_v30 = vld [vmem:[#allocation7 + $0x70] sm:$0xff]   ;;  %p1474_p4 = scmp.ne.s32.totalorder %s1080_s30, %s1473_s8  ;;  %p1479_p6 = scmp.lt.s32.totalorder %s1473_s8, %s1473_s8 }
  0x54   :  { %1173 = vmatprep.subr.bf16.mxu0 %v1325_v11  ;;  %v1340_v29 = vld [vmem:[#allocation7 + $0x98] sm:$0xff]   ;;  %v1342_v31 = vld [vmem:[#allocation7 + $0xe0] sm:$0xff]   ;;  %v1343_v32 = vld [vmem:[#allocation7 + $0x30] sm:$0xff]  }
  0x55   :  { %v1344_v33 = vld [vmem:[#allocation7 + $0xa0] sm:$0xff]   ;;  %v1345_v34 = vld [vmem:[#allocation7 + $0x78] sm:$0xff]   ;;  %v1346_v35 = vld [vmem:[#allocation7 + $0xe8] sm:$0xff]   ;;  %p1480_p7 = por %p1479_p6, %p1478_p5 }
  0x56   :  { %v1347_v36 = vld [vmem:[#allocation7 + $0x38] sm:$0xff]   ;;  %v1348_v37 = vld [vmem:[#allocation7 + $0xa8] sm:$0xff]   ;;  %v1349_v38 = vld [vmem:[#allocation7 + $0xf0] sm:$0xff]  }
  0x57   :  { %1098 = vmatmul.mubr.msk.bf16.vlgmr.msra.gmra.mrb[4].mxu1 %vm163_vm0, %v81_v3  ;;  %1174 = vmatpush3.bf16.msra.mxu0 %v1327_v13  ;;  %v1350_v39 = vld [vmem:[#allocation7 + $0x140] sm:$0xff]   ;;  %v1351_v40 = vld [vmem:[#allocation7 + $0xb0] sm:$0xff]   ;;  %v1353_v41 = vld [vmem:[#allocation7 + $0xf8] sm:$0xff]   ;;  %p1481_p8 = pnand %p1480_p7, %p1474_p4 }
  0x58   :  { %250 = vmatpush1.bf16.msra.mxu1 %v1317_v12  ;;  %281 = vmatprep.mubr.bf16.mxu1 %v1511_v0  ;;  %v1355_v42 = vld [vmem:[#allocation7 + $0xb8] sm:$0xff]   ;;  %v1352_v63 = vld [vmem:[#allocation7 + $0x100] sm:$0xff]   ;;  %v1354_v1 = vld [vmem:[#allocation7 + $0x148] sm:$0xff]  }
  0x59   :  { %1253 = vmatprep.subr.bf16.mxu1 %v1512_v15  ;;  %1175 = vmatprep.subr.bf16.mxu0 %v1329_v14  ;;  %v1617_v46 = vld [vmem:[%s1671_s2] sm:$0xff]  ;;  %v1356_v7 = vld [vmem:[#allocation7 + $0x108] sm:$0xff]   ;;  %v1357_v11 = vld [vmem:[#allocation7 + $0x150] sm:$0xff]  }
  0x5a   :  { %v95_v48 = vrot.slane %v1617_v46, %v94_v45  ;;  %v99_v49 = vrot.slane %v1617_v46, %v98_v47  ;;  %v103_v60 = vrot.slane %v1617_v46, %v102_v53  ;;  %v107_v62 = vrot.slane %v1617_v46, %v106_v56  ;;  %v1358_v14 = vld [vmem:[#allocation7 + $0x110] sm:$0xff]   ;;  %v1371_v47 = vld [vmem:[#allocation7 + $0x1a0] sm:$0xff]  }
  0x5b   :  { %1176 = vmatpush3.bf16.msra.mxu0 %v1331_v16  ;;  %v1359_v16 = vld [vmem:[#allocation7 + $0x180] sm:$0xff]   ;;  %v1370_v45 = vld [vmem:[#allocation7 + $0x130] sm:$0xff]  }
  0x5c   :  { %1177 = vmatprep.subr.bf16.mxu0 %v1333_v17  ;;  %v115_v17 = vrot.slane %v1617_v46, %v114_v8 }
  0x5f   :  { %1099 = vmatmul.mubr.msk.bf16.vlgmr.msra.gmra.mrb[8].mxu1 %vm163_vm0, %v81_v3  ;;  %1178 = vmatpush3.bf16.msra.mxu0 %v1335_v20 }
  0x60   :  { %1254 = vmatpush3.bf16.msra.mxu1 %v1320_v18  ;;  %1255 = vmatprep.mubr.msk.bf16.mxu1 %vm1513_vm1, %v1512_v15 }
  0x61   :  { %1191 = vmatprep.subr.bf16.mxu1 %v1326_v19  ;;  %1179 = vmatprep.subr.bf16.mxu0 %v1337_v21  ;;  %v1360_v19 = vld [vmem:[#allocation7 + $0x158] sm:$0xff]  }
  0x63   :  { %1180 = vmatpush3.bf16.msra.mxu0 %v1339_v23  ;;  %v1362_v23 = vld [vmem:[#allocation7 + $0x188] sm:$0xff]  }
  0x64   :  { %1181 = vmatprep.subr.bf16.mxu0 %v1341_v30  ;;  %v1364_v30 = vld [vmem:[#allocation7 + $0x120] sm:$0xff]  }
  0x67   :  { %1256 = vmatmul.mubr.msk.bf16.vlgmr.msra.gmra.mrb[12].mxu1 %vm163_vm0, %v81_v3  ;;  %1182 = vmatpush3.bf16.msra.mxu0 %v1343_v32 }
  0x68   :  { %1192 = vmatpush3.bf16.msra.mxu1 %v1328_v22  ;;  %1183 = vmatprep.subr.bf16.mxu0 %v1345_v34  ;;  %v1361_v22 = vld [vmem:[#allocation7 + $0x118] sm:$0xff]  }
  0x69   :  { %1193 = vmatprep.subr.bf16.mxu1 %v1330_v24 }
  0x6b   :  { %1184 = vmatpush3.bf16.msra.mxu0 %v1347_v36 }
  0x6c   :  { %1194 = vmatpush3.bf16.msra.mxu1 %v1332_v25  ;;  %1213 = vmatprep.subr.bf16.mxu0 %v1350_v39 }
  0x6d   :  { %1195 = vmatprep.subr.bf16.mxu1 %v1334_v26  ;;  %v1363_v26 = vld [vmem:[#allocation7 + $0x160] sm:$0xff]  }
  0x70   :  { %1196 = vmatpush3.bf16.msra.mxu1 %v1336_v27 }
  0x71   :  { %1197 = vmatprep.subr.bf16.mxu1 %v1338_v28 }
  0x74   :  { %1198 = vmatpush3.bf16.msra.mxu1 %v1340_v29  ;;  %v110_v29 = vsub.s32 4, %v1611_v44 }
  0x75   :  { %1199 = vmatprep.subr.bf16.mxu1 %v1342_v31  ;;  %v1365_v31 = vld [vmem:[#allocation7 + $0x190] sm:$0xff]  }
  0x78   :  { %1200 = vmatpush3.bf16.msra.mxu1 %v1344_v33  ;;  %v1366_v33 = vld [vmem:[#allocation7 + $0x168] sm:$0xff]  }
  0x79   :  { %1201 = vmatprep.subr.bf16.mxu1 %v1346_v35  ;;  %v111_v35 = vrot.slane %v1617_v46, %v110_v29 }
  0x7c   :  { %1202 = vmatpush3.bf16.msra.mxu1 %v1348_v37  ;;  %v1367_v37 = vld [vmem:[#allocation7 + $0x128] sm:$0xff]  }
  0x7d   :  { %1203 = vmatprep.subr.bf16.mxu1 %v1349_v38  ;;  %v1368_v38 = vld [vmem:[#allocation7 + $0x198] sm:$0xff]  }
  0x80   :  { %1204 = vmatpush3.bf16.msra.mxu1 %v1351_v40  ;;  %v1369_v40 = vld [vmem:[#allocation7 + $0x170] sm:$0xff]  }
  0x81   :  { %1205 = vmatprep.subr.bf16.mxu1 %v1353_v41 }
  0x84   :  { %1206 = vmatpush3.bf16.msra.mxu1 %v1355_v42 }
  0x85   :  { %1259 = vmatprep.subr.bf16.mxu1 %v1512_v15 }
 0x122   :  { %v201_v50 = vpop.f32.mrb[0].mxu1 }
 0x123   :  { %v202_v51 = vadd.f32 %v201_v50, %v95_v48  ;;  %v203_v52 = vpop.f32.mrb[1].mxu1  ;;  %v1372_v48 = vld [vmem:[#allocation7 + $0x178] sm:$0xff]   ;;  %v119_v50 = vrot.slane %v1617_v46, %v118_v43 }
 0x124   :  { %v204_v54 = vadd.f32 %v203_v52, %v99_v49  ;;  %v205_v55 = vpop.f32.mrb[2].mxu1  ;;  %v1374_v52 = vld [vmem:[#allocation7 + $0x1a8] sm:$0xff]   ;;  %v1376_v46 = vld [vmem:[#allocation7 + $0x1b8] sm:$0xff]  }
 0x125   :  { %v330_v57 = vmax.f32 %v202_v51, 0.0  ;;  %v206_v58 = vpop.f32.mrb[3].mxu1  ;;  %v1373_v51 = vld [vmem:[#allocation7 + $0x138] sm:$0xff]  }
 0x126   :  { %v331_v59 = vmax.f32 %v204_v54, 0.0  ;;  %v1375_v54 = vld [vmem:[#allocation7 + $0x1b0] sm:$0xff]   ;;  %v1378_v58 = vld [vmem:[#allocation8 + $0x8] sm:$0xff]  }
 0x127   :  { %v337_v0 = vpack.c.bf16 %v330_v57, %v330_v57  ;;  %v1377_v57 = vld [vmem:[#allocation8] sm:$0xff]  }
 0x128   :  { %v338_v61 = vpack.c.bf16 %v331_v59, %v331_v59  ;;  %v1379_v59 = vld [vmem:[#allocation8 + $0x10] sm:$0xff]  }
 0x12a   :  { %v242_v2 = vpop.f32.mrb[4].mxu1  ;;  %831 = vmatprep.mubr.bf16.mxu0 %v338_v61  ;;  %v1381_v61 = vld [vmem:[#allocation8 + $0x20] sm:$0xff]  }
 0x12b   :  { %v243_v3 = vadd.f32 %v242_v2, %v103_v60  ;;  %v244_v4 = vpop.f32.mrb[5].mxu1  ;;  %832 = vmatmul.mubr.bf16.vlgmr.msra.gmra.mrb[0].mxu0 %v337_v0  ;;  %v1380_v60 = vld [vmem:[#allocation8 + $0x18] sm:$0xff]  }
 0x12c   :  { %v245_v5 = vadd.f32 %v244_v4, %v107_v62  ;;  %1214 = vmatpush3.bf16.msra.mxu0 %v1352_v63  ;;  %v246_v6 = vpop.f32.mrb[6].mxu1  ;;  %v1382_v62 = vld [vmem:[#allocation8 + $0x28] sm:$0xff]   ;;  %v1383_v63 = vld [vmem:[#allocation8 + $0x30] sm:$0xff]   ;;  %v1384_v0 = vld [vmem:[#allocation8 + $0x38] sm:$0xff]  }
 0x12d   :  { %v332_v9 = vmax.f32 %v243_v3, 0.0  ;;  %v247_v10 = vpop.f32.mrb[7].mxu1  ;;  %1215 = vmatprep.subr.bf16.mxu0 %v1354_v1  ;;  %v1101_v6 = vld [vmem:[%s1673_s4] ss:$0 sm:$0xff] }
 0x12e   :  { %v333_v12 = vmax.f32 %v245_v5, 0.0 }
 0x12f   :  { %v339_v18 = vpack.c.bf16 %v332_v9, %v332_v9 }
 0x130   :  { %v340_v13 = vpack.c.bf16 %v333_v12, %v333_v12  ;;  %1216 = vmatpush3.bf16.msra.mxu0 %v1356_v7 }
 0x131   :  { %1217 = vmatprep.subr.bf16.mxu0 %v1357_v11 }
 0x132   :  { %871 = vmatprep.mubr.bf16.mxu1 %v340_v13  ;;  %v283_v20 = vpop.f32.mrb[8].mxu1 }
 0x133   :  { %872 = vmatmul.mubr.bf16.vlgmr.msra.gmra.mrb[16].mxu1 %v339_v18  ;;  %v285_v21 = vpop.f32.mrb[9].mxu1  ;;  %v284_v42 = vadd.f32 %v283_v20, %v111_v35 }
 0x134   :  { %1218 = vmatpush3.bf16.msra.mxu0 %v1358_v14  ;;  %1260 = vmatpush3.bf16.msra.mxu1 %v1359_v16  ;;  %v286_v24 = vadd.f32 %v285_v21, %v115_v17  ;;  %v287_v25 = vpop.f32.mrb[10].mxu1 }
 0x135   :  { %1219 = vmatprep.subr.bf16.mxu0 %v1360_v19  ;;  %1261 = vmatprep.subr.bf16.mxu1 %v1512_v15  ;;  %v288_v27 = vpop.f32.mrb[11].mxu1  ;;  %v334_v49 = vmax.f32 %v284_v42, 0.0 }
 0x136   :  { %v335_v28 = vmax.f32 %v286_v24, 0.0  ;;  %1275 = vmatprep.mubr.msk.bf16.mxu1 %vm1513_vm1, %v1512_v15  ;;  %v1158_v27 = vld [vmem:[%s1675_s6] ss:$0 sm:$0xff] }
 0x137   :  { %v341_v53 = vpack.c.bf16 %v334_v49, %v334_v49 }
 0x138   :  { %1220 = vmatpush3.bf16.msra.mxu0 %v1361_v22  ;;  %1262 = vmatpush3.bf16.msra.mxu1 %v1362_v23  ;;  %v342_v32 = vpack.c.bf16 %v335_v28, %v335_v28 }
 0x139   :  { %1221 = vmatprep.subr.bf16.mxu0 %v1363_v26  ;;  %1263 = vmatprep.subr.bf16.mxu1 %v1512_v15 }
 0x13a   :  { %v324_v34 = vpop.f32.mrb[12].mxu1  ;;  %911 = vmatprep.mubr.bf16.mxu0 %v342_v32 }
 0x13b   :  { %v1257_v36 = vpop.f32.mrb[13].mxu1  ;;  %v325_v44 = vadd.f32 %v324_v34, %v119_v50 }
 0x13c   :  { %1222 = vmatpush3.bf16.msra.mxu0 %v1364_v30  ;;  %1264 = vmatpush3.bf16.msra.mxu1 %v1365_v31  ;;  %v327_v39 = vpop.f32.mrb[14].mxu1 }
 0x13d   :  { %1223 = vmatprep.subr.bf16.mxu0 %v1366_v33  ;;  %1265 = vmatprep.subr.bf16.mxu1 %v1512_v15  ;;  %v1258_v41 = vpop.f32.mrb[15].mxu1  ;;  %v336_v55 = vmax.f32 %v325_v44, 0.0 }
 0x13f   :  { %v343_v56 = vpack.c.bf16 %v336_v55, %v336_v55 }
 0x140   :  { %1224 = vmatpush3.bf16.msra.mxu0 %v1367_v37  ;;  %1266 = vmatpush3.bf16.msra.mxu1 %v1368_v38 }
 0x141   :  { %1225 = vmatprep.subr.bf16.mxu0 %v1369_v40  ;;  %1267 = vmatprep.subr.bf16.mxu1 %v1512_v15 }
 0x144   :  { %1226 = vmatpush3.bf16.msra.mxu0 %v1370_v45  ;;  %1268 = vmatpush3.bf16.msra.mxu1 %v1371_v47 }
 0x145   :  { %1227 = vmatprep.subr.bf16.mxu0 %v1372_v48  ;;  %1269 = vmatprep.subr.bf16.mxu1 %v1512_v15 }
 0x148   :  { %1228 = vmatpush3.bf16.msra.mxu0 %v1373_v51  ;;  %1270 = vmatpush3.bf16.msra.mxu1 %v1374_v52 }
 0x149   :  { %1271 = vmatprep.subr.bf16.mxu1 %v1512_v15  ;;  %1279 = vmatprep.subr.bf16.mxu0 %v1512_v15 }
 0x14b   :  { %912 = vmatmul.mubr.bf16.vlgmr.msra.gmra.mrb[4].mxu0 %v341_v53 }
 0x14c   :  { %1272 = vmatpush3.bf16.msra.mxu1 %v1375_v54  ;;  %1295 = vmatprep.mubr.msk.bf16.mxu0 %vm1513_vm1, %v1512_v15 }
 0x14d   :  { %1273 = vmatprep.subr.bf16.mxu1 %v1512_v15  ;;  %1280 = vmatpush3.bf16.msra.mxu0 %v1377_v57 }
 0x14e   :  { %1281 = vmatprep.subr.bf16.mxu0 %v1512_v15 }
 0x150   :  { %1274 = vmatpush3.bf16.msra.mxu1 %v1376_v46 }
 0x151   :  { %1282 = vmatpush3.bf16.msra.mxu0 %v1378_v58 }
 0x152   :  { %1283 = vmatprep.subr.bf16.mxu0 %v1512_v15 }
 0x153   :  { %1276 = vmatmul.mubr.bf16.vlgmr.msra.gmra.mrb[20].mxu1 %v343_v56 }
 0x155   :  { %1284 = vmatpush3.bf16.msra.mxu0 %v1379_v59 }
 0x156   :  { %1285 = vmatprep.subr.bf16.mxu0 %v1512_v15 }
 0x159   :  { %1286 = vmatpush3.bf16.msra.mxu0 %v1380_v60 }
 0x15a   :  { %1287 = vmatprep.subr.bf16.mxu0 %v1512_v15 }
 0x15d   :  { %1288 = vmatpush3.bf16.msra.mxu0 %v1381_v61 }
 0x15e   :  { %1289 = vmatprep.subr.bf16.mxu0 %v1512_v15 }
 0x161   :  { %1290 = vmatpush3.bf16.msra.mxu0 %v1382_v62 }
 0x162   :  { %1291 = vmatprep.subr.bf16.mxu0 %v1512_v15 }
 0x165   :  { %1292 = vmatpush3.bf16.msra.mxu0 %v1383_v63 }
 0x166   :  { %1293 = vmatprep.subr.bf16.mxu0 %v1512_v15 }
 0x169   :  { %1294 = vmatpush3.bf16.msra.mxu0 %v1384_v0 }
 0x1fe   :  { %v1185_v1 = vpop.f32.mrb[0].mxu0 }
 0x1ff   :  { %v1186_v2 = vpop.f32.mrb[1].mxu0 }
 0x200   :  { %v1187_v3 = vadd.f32 %v1186_v2, %v1185_v1  ;;  %v1188_v4 = vpop.f32.mrb[2].mxu0 }
 0x201   :  { %v1189_v5 = vpop.f32.mrb[3].mxu0 }
 0x202   :  { %v834_v9 = vadd.f32 %v1187_v3, %v1101_v6 }
 0x206   :  { %v1207_v7 = vpop.f32.mrb[16].mxu1 }
 0x207   :  { %v1208_v8 = vpop.f32.mrb[17].mxu1 }
 0x208   :  { %v1209_v10 = vadd.f32 %v1208_v8, %v1207_v7  ;;  %v1210_v11 = vpop.f32.mrb[18].mxu1 }
 0x209   :  { %v1211_v12 = vpop.f32.mrb[19].mxu1 }
 0x20a   :  { %v874_v13 = vadd.f32 %v1209_v10, %v834_v9 }
 0x21e   :  { %v1229_v14 = vpop.f32.mrb[4].mxu0 }
 0x21f   :  { %v1230_v15 = vpop.f32.mrb[5].mxu0 }
 0x220   :  { %v1231_v16 = vadd.f32 %v1230_v15, %v1229_v14  ;;  %v1232_v17 = vpop.f32.mrb[6].mxu0 }
 0x221   :  { %v1233_v18 = vpop.f32.mrb[7].mxu0 }
 0x222   :  { %v914_v19 = vadd.f32 %v1231_v16, %v874_v13 }
 0x226   :  { %v953_v20 = vpop.f32.mrb[20].mxu1 }
 0x227   :  { %v954_v21 = vadd.f32 %v953_v20, %v914_v19  ;;  %v1277_v22 = vpop.f32.mrb[21].mxu1 }
 0x228   :  { %v956_v23 = vpop.f32.mrb[22].mxu1 }
 0x229   :  { %v959_v24 = vmax.f32 %v954_v21, 0.0  ;;  %v1278_v25 = vpop.f32.mrb[23].mxu1 }
 0x22b   :  { %v960_v26 = vpack.c.bf16 %v959_v24, %v959_v24 }
 0x22d   :  { %1296 = vmatmul.mubr.bf16.vlgmr.msra.gmra.mrb[8].mxu0 %v960_v26 }
 0x300   :  { %v1066_v28 = vpop.f32.mrb[8].mxu0 }
 0x301   :  { %v1067_v29 = vadd.f32 %v1158_v27, %v1066_v28  ;;  %v1297_v30 = vpop.f32.mrb[9].mxu0 }
 0x302   :  { %v1069_v31 = vpop.f32.mrb[10].mxu0 }
 0x303   :  { %1072 = vst [vmem:[#allocation10] sm:$0xff] %v1067_v29  ;;  %v1298_v32 = vpop.f32.mrb[11].mxu0 }
 0x304   :  { %1484 = shalt.err (!%p1481_p8)
}
 0x305   :  { %s1485_s6 = scalar_lea.hbm %s1676_s7, 128 }
 0x306   :  { %p1486_p9 = scmp.ne.s32.totalorder %s1676_s7, %s1485_s6  ;;  %p1489_p10 = scmp.lt.u32.totalorder %s1485_s6, %s1676_s7 }
 0x308   :  { %p1491_p11 = pnand %p1489_p10, %p1486_p9 }
 0x30a   :  { %1494 = shalt.err (!%p1491_p11)
}
 0x30b   :  { %1082 = dma.vmem_to_hbm [thread:$0]  %s1080_s30, 128, %s1676_s7, [#allocation4]  }
 0x30c   :  { %1501 = dma.done.wait [#allocation4], 128  }
 0x30d   :  { %1502 = vsyncadd [#allocation4], 4294967168 }
 0x30e   :  { %1086 = vsyncpa [#allocation3], 1 }
 0x30f   :  { %1087 = vsyncpa [#allocation6], 1 }
 0x310   :  { %1088 = vsyncpa [#allocation9], 1 }
 0x311   :  { %1089 = vsyncpa [#allocation4], 1 }

</bundles_post_ra>
